<compile_context>
chip_gen: v6e
topology: v6e:2x2x1
jax: 0.10.0
libtpu: 0.0.40
codegen_flags: <defaults>
</compile_context>

<pallas_src>
import jax
import jax.numpy as jnp
from jax.experimental import pallas as pl
from jax.experimental.pallas import tpu as pltpu

GAMMA = 2.0          # smp FocalLoss default (statically 2 -> integer square in-kernel)
DICE_EPS = 1e-7      # smp Dice/Jaccard clamp_min eps


def _mixloss_stats_kernel(x_ref, y_ref,
                          sum_p_ref, inter_ref, count_ref,
                          nll_ref, smooth_ref, focal_ref):
    """Accumulate per-class / per-pixel statistics for one (batch, pixel-tile) step.

    x_ref:      (C, TN)  logits (native dtype; cast to f32 on-chip)
    y_ref:      (1, TN)  int32 labels
    sum_p_ref:  (C, 1)   sum_i p[c, i]                    (softmax prob mass per class)
    inter_ref:  (C, 1)   sum_i p[c, i] * 1{y_i == c}      (dice/jaccard intersection)
    count_ref:  (C, 1)   sum_i 1{y_i == c}                (class pixel count)
    nll_ref:    (1, 1)   sum_i -log p_true(i)             (CE nll)
    smooth_ref: (1, 1)   sum_i -sum_c log p_c(i)          (label-smoothing term)
    focal_ref:  (1, 1)   sum_i focal_i (alpha=1, gamma=2)
    Outputs are resident accumulators across the pixel-tile ("arbitrary") grid axis.
    """
    i = pl.program_id(1)

    @pl.when(i == 0)
    def _init():
        sum_p_ref[...] = jnp.zeros_like(sum_p_ref)
        inter_ref[...] = jnp.zeros_like(inter_ref)
        count_ref[...] = jnp.zeros_like(count_ref)
        nll_ref[...] = jnp.zeros_like(nll_ref)
        smooth_ref[...] = jnp.zeros_like(smooth_ref)
        focal_ref[...] = jnp.zeros_like(focal_ref)

    x = x_ref[...].astype(jnp.float32)        # (C, TN)
    y = y_ref[...]                            # (1, TN) int32
    c, tn = x.shape

    # one-hot over classes (classes on the sublane axis)
    cls_iota = jax.lax.broadcasted_iota(jnp.int32, (c, tn), 0)
    onehot = (cls_iota == y).astype(jnp.float32)            # (C, TN)

    # softmax / logsumexp over the (small) class / sublane axis
    m = jnp.max(x, axis=0, keepdims=True)                   # (1, TN)
    ez = jnp.exp(x - m)                                     # (C, TN)
    se = jnp.sum(ez, axis=0, keepdims=True)                 # (1, TN)
    p = ez / se                                             # (C, TN) softmax probs
    lse = m + jnp.log(se)                                   # (1, TN) logsumexp(x)

    # true-class logit; CE pieces derived algebraically (no masked logp reduction)
    logit_t = jnp.sum(x * onehot, axis=0, keepdims=True)    # (1, TN)
    nll = lse - logit_t                                     # -log p_true
    smooth = c * lse - jnp.sum(x, axis=0, keepdims=True)    # -sum_c log p_c

    # focal: BCE-with-logits of true-class logit at target=1 (alpha=1), gamma=2
    bce = jnp.maximum(-logit_t, 0.0) + jnp.log1p(jnp.exp(-jnp.abs(logit_t)))
    one_m_pt = 1.0 - jnp.exp(-bce)
    focal = one_m_pt * one_m_pt * bce                        # integer square, not pow

    # lane-axis reductions into resident accumulators
    sum_p_ref[...] += jnp.sum(p, axis=-1, keepdims=True)
    inter_ref[...] += jnp.sum(p * onehot, axis=-1, keepdims=True)
    count_ref[...] += jnp.sum(onehot, axis=-1, keepdims=True)
    nll_ref[...] += jnp.sum(nll, axis=-1, keepdims=True)
    smooth_ref[...] += jnp.sum(smooth, axis=-1, keepdims=True)
    focal_ref[...] += jnp.sum(focal, axis=-1, keepdims=True)


def _pick_tile_n(hw, cap=2048):
    """Largest multiple of 128 that divides H*W, capped at `cap`."""
    if hw % 128 != 0:
        # TODO(synk): pad H*W to a multiple of 128 and mask padded pixels (ignore label).
        raise ValueError("H*W must be a multiple of 128 for this kernel")
    t = (min(cap, hw) // 128) * 128
    while t > 128 and hw % t != 0:
        t -= 128
    return t


def mix_loss(y_pred, y_true, ls=0.1, tile_n=None):
    """MixLoss forward: y_pred (B, C, H, W) float logits, y_true (B, H, W) int labels."""
    b, c, h, w = y_pred.shape
    hw = h * w
    n = b * hw
    if tile_n is None:
        tile_n = _pick_tile_n(hw)
    assert hw % tile_n == 0 and tile_n % 128 == 0

    # Free reshapes only: NCHW is already class-major per batch element (no relayout,
    # no dtype cast in the wrapper -> logits stream through HBM exactly once).
    x = y_pred.reshape(b, c, hw)
    y = y_true.reshape(b, 1, hw).astype(jnp.int32)

    f32 = jnp.float32
    outs = pl.pallas_call(
        _mixloss_stats_kernel,
        out_shape=(
            jax.ShapeDtypeStruct((b, c, 1), f32),   # sum_p per class
            jax.ShapeDtypeStruct((b, c, 1), f32),   # intersection per class
            jax.ShapeDtypeStruct((b, c, 1), f32),   # class pixel count
            jax.ShapeDtypeStruct((b, 1, 1), f32),   # sum nll
            jax.ShapeDtypeStruct((b, 1, 1), f32),   # sum smoothing term
            jax.ShapeDtypeStruct((b, 1, 1), f32),   # sum focal
        ),
        grid_spec=pltpu.PrefetchScalarGridSpec(
            num_scalar_prefetch=0,
            grid=(b, hw // tile_n),
            in_specs=[
                pl.BlockSpec((None, c, tile_n), lambda bi, i: (bi, 0, i)),
                pl.BlockSpec((None, 1, tile_n), lambda bi, i: (bi, 0, i)),
            ],
            out_specs=[
                pl.BlockSpec((None, c, 1), lambda bi, i: (bi, 0, 0)),
                pl.BlockSpec((None, c, 1), lambda bi, i: (bi, 0, 0)),
                pl.BlockSpec((None, c, 1), lambda bi, i: (bi, 0, 0)),
                pl.BlockSpec((None, 1, 1), lambda bi, i: (bi, 0, 0)),
                pl.BlockSpec((None, 1, 1), lambda bi, i: (bi, 0, 0)),
                pl.BlockSpec((None, 1, 1), lambda bi, i: (bi, 0, 0)),
            ],
        ),
        compiler_params=pltpu.CompilerParams(
            # Batch axis parallel -> megacore (v7x) splits batches across TensorCores,
            # each with its own per-batch stat slabs; pixel-tile axis is a reduction.
            dimension_semantics=("parallel", "arbitrary"),
        ),
    )(x, y)

    sum_p_b, inter_b, count_b, nll_b, smooth_b, focal_b = outs
    sum_p = jnp.sum(sum_p_b[:, :, 0], axis=0)      # (C,)
    inter = jnp.sum(inter_b[:, :, 0], axis=0)
    count = jnp.sum(count_b[:, :, 0], axis=0)
    nll_sum = jnp.sum(nll_b)
    smooth_sum = jnp.sum(smooth_b)
    focal_sum = jnp.sum(focal_b)

    nf = jnp.float32(n)
    eps = jnp.float32(ls)

    # SoftCrossEntropyLoss(smooth_factor=ls)
    ce = (1.0 - eps) * (nll_sum / nf) + (eps / c) * (smooth_sum / nf)

    # FocalLoss(mode='multiclass', alpha=1.0): per-class mean over N, summed over classes
    fo = focal_sum / nf

    # DiceLoss(mode='multiclass', smooth=ls)
    card = sum_p + count
    mask = (count > 0).astype(jnp.float32)
    dice_score = (2.0 * inter + ls) / jnp.maximum(card + ls, DICE_EPS)
    di = jnp.mean((1.0 - dice_score) * mask)

    # JaccardLoss(mode='multiclass', smooth=ls)
    union = card - inter
    jac_score = (inter + ls) / jnp.maximum(union + ls, DICE_EPS)
    ja = jnp.mean((1.0 - jac_score) * mask)

    return 0.25 * (ce + fo + di + ja)


def mix_loss_ref(y_pred, y_true, ls=0.1):
    """Pure-JAX reference mirroring smp loss semantics (for validation)."""
    b, c, h, w = y_pred.shape
    n = b * h * w
    x = jnp.transpose(y_pred, (0, 2, 3, 1)).reshape(n, c).astype(jnp.float32)
    y = y_true.reshape(n).astype(jnp.int32)
    logp = jax.nn.log_softmax(x, axis=-1)
    p = jnp.exp(logp)
    onehot = jax.nn.one_hot(y, c, dtype=jnp.float32)

    nll = -jnp.take_along_axis(logp, y[:, None], axis=-1)[:, 0]
    smooth = -jnp.sum(logp, axis=-1)
    ce = (1.0 - ls) * jnp.mean(nll) + (ls / c) * jnp.mean(smooth)

    logit_t = jnp.take_along_axis(x, y[:, None], axis=-1)[:, 0]
    bce = jnp.logaddexp(0.0, -logit_t)
    pt = jnp.exp(-bce)
    fo = jnp.sum((1.0 - pt) ** GAMMA * bce) / n

    inter = jnp.sum(p * onehot, axis=0)
    card = jnp.sum(p + onehot, axis=0)
    count = jnp.sum(onehot, axis=0)
    mask = (count > 0).astype(jnp.float32)
    di = jnp.mean((1.0 - (2.0 * inter + ls) / jnp.maximum(card + ls, DICE_EPS)) * mask)
    ja = jnp.mean((1.0 - (inter + ls) / jnp.maximum(card - inter + ls, DICE_EPS)) * mask)
    return 0.25 * (ce + fo + di + ja)


if __name__ == "__main__":
    B, C, H, W = 2, 4, 16, 16   # N = B*H*W = 512 pixels, H*W = 256 -> tile_n = 256
    LS = 0.1                    # args.ls (label smoothing / dice smooth)

    key = jax.random.PRNGKey(0)
    k1, k2 = jax.random.split(key)
    y_pred = jax.random.normal(k1, (B, C, H, W), dtype=jnp.float32)
    y_true = jax.random.randint(k2, (B, H, W), 0, C, dtype=jnp.int32)

    loss = jax.block_until_ready(mix_loss(y_pred, y_true, ls=LS))
    ref = jax.block_until_ready(mix_loss_ref(y_pred, y_true, ls=LS))

    assert jnp.allclose(loss, ref, rtol=1e-4, atol=1e-5), (loss, ref)
    print("KERNEL_OK")
</pallas_src>

<mosaic_0001>
module attributes {stable_mosaic.version = 11 : i64} {
  func.func @_mixloss_stats_kernel(%arg0: i32, %arg1: i32, %arg2: memref<1x4x256xf32, #tpu.memory_space<vmem>>, %arg3: memref<1x1x256xi32, #tpu.memory_space<vmem>>, %arg4: memref<1x4x1xf32, #tpu.memory_space<vmem>>, %arg5: memref<1x4x1xf32, #tpu.memory_space<vmem>>, %arg6: memref<1x4x1xf32, #tpu.memory_space<vmem>>, %arg7: memref<1x1x1xf32, #tpu.memory_space<vmem>>, %arg8: memref<1x1x1xf32, #tpu.memory_space<vmem>>, %arg9: memref<1x1x1xf32, #tpu.memory_space<vmem>>) attributes {dimension_semantics = [#tpu.dimension_semantics<parallel>, #tpu.dimension_semantics<arbitrary>], iteration_bounds = array<i64: 2, 1>, scalar_prefetch = 0 : i64, scratch_operands = 0 : i64, tpu.core_type = #tpu.core_type<tc>, window_params = [{transform_indices = @transform_0, window_bounds = array<i64: 1, 4, 256>}, {transform_indices = @transform_1, window_bounds = array<i64: 1, 1, 256>}, {transform_indices = @transform_2, window_bounds = array<i64: 1, 4, 1>}, {transform_indices = @transform_3, window_bounds = array<i64: 1, 4, 1>}, {transform_indices = @transform_4, window_bounds = array<i64: 1, 4, 1>}, {transform_indices = @transform_5, window_bounds = array<i64: 1, 1, 1>}, {transform_indices = @transform_6, window_bounds = array<i64: 1, 1, 1>}, {transform_indices = @transform_7, window_bounds = array<i64: 1, 1, 1>}]} {
    %c0_i32 = arith.constant 0 : i32
    %0 = arith.cmpi eq, %arg1, %c0_i32 : i32
    %1 = arith.extui %0 : i1 to i32
    %c0_i32_0 = arith.constant 0 : i32
    %2 = arith.cmpi ne, %1, %c0_i32_0 : i32
    scf.if %2 {
      %cst_57 = arith.constant 0.000000e+00 : f32
      %98 = vector.broadcast %cst_57 : f32 to vector<4x1xf32>
      %c0_58 = arith.constant 0 : index
      %c0_59 = arith.constant 0 : index
      %c0_60 = arith.constant 0 : index
      %99 = vector.load %arg4[%c0_58, %c0_59, %c0_60] : memref<1x4x1xf32, #tpu.memory_space<vmem>>, vector<1x4x1xf32>
      %100 = vector.shape_cast %99 : vector<1x4x1xf32> to vector<4x1xf32>
      %101 = vector.shape_cast %98 : vector<4x1xf32> to vector<1x4x1xf32>
      tpu.vector_store %arg4[%c0_58, %c0_59, %c0_60], %101 {strides = array<i32>} : memref<1x4x1xf32, #tpu.memory_space<vmem>>, vector<1x4x1xf32>,
      %cst_61 = arith.constant 0.000000e+00 : f32
      %102 = vector.broadcast %cst_61 : f32 to vector<4x1xf32>
      %c0_62 = arith.constant 0 : index
      %c0_63 = arith.constant 0 : index
      %c0_64 = arith.constant 0 : index
      %103 = vector.load %arg5[%c0_62, %c0_63, %c0_64] : memref<1x4x1xf32, #tpu.memory_space<vmem>>, vector<1x4x1xf32>
      %104 = vector.shape_cast %103 : vector<1x4x1xf32> to vector<4x1xf32>
      %105 = vector.shape_cast %102 : vector<4x1xf32> to vector<1x4x1xf32>
      tpu.vector_store %arg5[%c0_62, %c0_63, %c0_64], %105 {strides = array<i32>} : memref<1x4x1xf32, #tpu.memory_space<vmem>>, vector<1x4x1xf32>,
      %cst_65 = arith.constant 0.000000e+00 : f32
      %106 = vector.broadcast %cst_65 : f32 to vector<4x1xf32>
      %c0_66 = arith.constant 0 : index
      %c0_67 = arith.constant 0 : index
      %c0_68 = arith.constant 0 : index
      %107 = vector.load %arg6[%c0_66, %c0_67, %c0_68] : memref<1x4x1xf32, #tpu.memory_space<vmem>>, vector<1x4x1xf32>
      %108 = vector.shape_cast %107 : vector<1x4x1xf32> to vector<4x1xf32>
      %109 = vector.shape_cast %106 : vector<4x1xf32> to vector<1x4x1xf32>
      tpu.vector_store %arg6[%c0_66, %c0_67, %c0_68], %109 {strides = array<i32>} : memref<1x4x1xf32, #tpu.memory_space<vmem>>, vector<1x4x1xf32>,
      %cst_69 = arith.constant 0.000000e+00 : f32
      %110 = vector.broadcast %cst_69 : f32 to vector<1x1xf32>
      %c0_70 = arith.constant 0 : index
      %c0_71 = arith.constant 0 : index
      %c0_72 = arith.constant 0 : index
      %111 = vector.load %arg7[%c0_70, %c0_71, %c0_72] : memref<1x1x1xf32, #tpu.memory_space<vmem>>, vector<1x1x1xf32>
      %112 = vector.shape_cast %111 : vector<1x1x1xf32> to vector<1x1xf32>
      %113 = vector.shape_cast %110 : vector<1x1xf32> to vector<1x1x1xf32>
      tpu.vector_store %arg7[%c0_70, %c0_71, %c0_72], %113 {strides = array<i32>} : memref<1x1x1xf32, #tpu.memory_space<vmem>>, vector<1x1x1xf32>,
      %cst_73 = arith.constant 0.000000e+00 : f32
      %114 = vector.broadcast %cst_73 : f32 to vector<1x1xf32>
      %c0_74 = arith.constant 0 : index
      %c0_75 = arith.constant 0 : index
      %c0_76 = arith.constant 0 : index
      %115 = vector.load %arg8[%c0_74, %c0_75, %c0_76] : memref<1x1x1xf32, #tpu.memory_space<vmem>>, vector<1x1x1xf32>
      %116 = vector.shape_cast %115 : vector<1x1x1xf32> to vector<1x1xf32>
      %117 = vector.shape_cast %114 : vector<1x1xf32> to vector<1x1x1xf32>
      tpu.vector_store %arg8[%c0_74, %c0_75, %c0_76], %117 {strides = array<i32>} : memref<1x1x1xf32, #tpu.memory_space<vmem>>, vector<1x1x1xf32>,
      %cst_77 = arith.constant 0.000000e+00 : f32
      %118 = vector.broadcast %cst_77 : f32 to vector<1x1xf32>
      %c0_78 = arith.constant 0 : index
      %c0_79 = arith.constant 0 : index
      %c0_80 = arith.constant 0 : index
      %119 = vector.load %arg9[%c0_78, %c0_79, %c0_80] : memref<1x1x1xf32, #tpu.memory_space<vmem>>, vector<1x1x1xf32>
      %120 = vector.shape_cast %119 : vector<1x1x1xf32> to vector<1x1xf32>
      %121 = vector.shape_cast %118 : vector<1x1xf32> to vector<1x1x1xf32>
      tpu.vector_store %arg9[%c0_78, %c0_79, %c0_80], %121 {strides = array<i32>} : memref<1x1x1xf32, #tpu.memory_space<vmem>>, vector<1x1x1xf32>,
    } else {
    }
    %c0 = arith.constant 0 : index
    %c0_1 = arith.constant 0 : index
    %c0_2 = arith.constant 0 : index
    %3 = vector.load %arg2[%c0, %c0_1, %c0_2] : memref<1x4x256xf32, #tpu.memory_space<vmem>>, vector<1x4x256xf32>
    %4 = vector.shape_cast %3 : vector<1x4x256xf32> to vector<4x256xf32>
    %c0_3 = arith.constant 0 : index
    %c0_4 = arith.constant 0 : index
    %c0_5 = arith.constant 0 : index
    %5 = vector.load %arg3[%c0_3, %c0_4, %c0_5] : memref<1x1x256xi32, #tpu.memory_space<vmem>>, vector<1x1x256xi32>
    %6 = vector.shape_cast %5 : vector<1x1x256xi32> to vector<1x256xi32>
    %7 = tpu.iota {dimensions = array<i32: 0>} : vector<4x256xi32>
    %8 = vector.broadcast %6 : vector<1x256xi32> to vector<4x256xi32>
    %9 = arith.cmpi eq, %7, %8 : vector<4x256xi32>
    %10 = arith.extui %9 : vector<4x256xi1> to vector<4x256xi32>
    %11 = arith.sitofp %10 : vector<4x256xi32> to vector<4x256xf32>
    %cst = arith.constant dense<0xFF800000> : vector<256xf32>
    %12 = vector.multi_reduction <maximumf>, %4, %cst [0] : vector<4x256xf32> to vector<256xf32>
    %13 = vector.shape_cast %12 : vector<256xf32> to vector<1x256xf32>
    %14 = vector.broadcast %13 : vector<1x256xf32> to vector<4x256xf32>
    %15 = arith.subf %4, %14 : vector<4x256xf32>
    %16 = math.exp %15 : vector<4x256xf32>
    %cst_6 = arith.constant dense<0.000000e+00> : vector<256xf32>
    %17 = vector.multi_reduction <add>, %16, %cst_6 [0] : vector<4x256xf32> to vector<256xf32>
    %18 = vector.shape_cast %17 : vector<256xf32> to vector<1x256xf32>
    %19 = vector.broadcast %18 : vector<1x256xf32> to vector<4x256xf32>
    %20 = arith.divf %16, %19 : vector<4x256xf32>
    %21 = math.log %18 : vector<1x256xf32>
    %22 = arith.addf %13, %21 : vector<1x256xf32>
    %23 = arith.mulf %4, %11 : vector<4x256xf32>
    %cst_7 = arith.constant dense<0.000000e+00> : vector<256xf32>
    %24 = vector.multi_reduction <add>, %23, %cst_7 [0] : vector<4x256xf32> to vector<256xf32>
    %25 = vector.shape_cast %24 : vector<256xf32> to vector<1x256xf32>
    %26 = arith.subf %22, %25 : vector<1x256xf32>
    %cst_8 = arith.constant 4.000000e+00 : f32
    %27 = vector.broadcast %cst_8 : f32 to vector<1x256xf32>
    %28 = arith.mulf %27, %22 : vector<1x256xf32>
    %cst_9 = arith.constant dense<0.000000e+00> : vector<256xf32>
    %29 = vector.multi_reduction <add>, %4, %cst_9 [0] : vector<4x256xf32> to vector<256xf32>
    %30 = vector.shape_cast %29 : vector<256xf32> to vector<1x256xf32>
    %31 = arith.subf %28, %30 : vector<1x256xf32>
    %cst_10 = arith.constant 0.000000e+00 : f32
    %32 = vector.broadcast %cst_10 : f32 to vector<1x256xf32>
    %33 = arith.subf %32, %25 : vector<1x256xf32>
    %cst_11 = arith.constant 0.000000e+00 : f32
    %34 = vector.broadcast %cst_11 : f32 to vector<1x256xf32>
    %35 = arith.maximumf %33, %34 : vector<1x256xf32>
    %36 = math.absf %25 : vector<1x256xf32>
    %cst_12 = arith.constant 0.000000e+00 : f32
    %37 = vector.broadcast %cst_12 : f32 to vector<1x256xf32>
    %38 = arith.subf %37, %36 : vector<1x256xf32>
    %39 = math.exp %38 : vector<1x256xf32>
    %40 = math.log1p %39 : vector<1x256xf32>
    %41 = arith.addf %35, %40 : vector<1x256xf32>
    %cst_13 = arith.constant 0.000000e+00 : f32
    %42 = vector.broadcast %cst_13 : f32 to vector<1x256xf32>
    %43 = arith.subf %42, %41 : vector<1x256xf32>
    %44 = math.exp %43 : vector<1x256xf32>
    %cst_14 = arith.constant 1.000000e+00 : f32
    %45 = vector.broadcast %cst_14 : f32 to vector<1x256xf32>
    %46 = arith.subf %45, %44 : vector<1x256xf32>
    %47 = arith.mulf %46, %46 : vector<1x256xf32>
    %48 = arith.mulf %47, %41 : vector<1x256xf32>
    %c0_15 = arith.constant 0 : index
    %c0_16 = arith.constant 0 : index
    %c0_17 = arith.constant 0 : index
    %49 = vector.load %arg4[%c0_15, %c0_16, %c0_17] : memref<1x4x1xf32, #tpu.memory_space<vmem>>, vector<1x4x1xf32>
    %50 = vector.shape_cast %49 : vector<1x4x1xf32> to vector<4x1xf32>
    %cst_18 = arith.constant dense<0.000000e+00> : vector<4xf32>
    %51 = vector.multi_reduction <add>, %20, %cst_18 [1] : vector<4x256xf32> to vector<4xf32>
    %52 = vector.shape_cast %51 : vector<4xf32> to vector<4x1xf32>
    %53 = arith.addf %50, %52 : vector<4x1xf32>
    %c0_19 = arith.constant 0 : index
    %c0_20 = arith.constant 0 : index
    %c0_21 = arith.constant 0 : index
    %54 = vector.load %arg4[%c0_19, %c0_20, %c0_21] : memref<1x4x1xf32, #tpu.memory_space<vmem>>, vector<1x4x1xf32>
    %55 = vector.shape_cast %54 : vector<1x4x1xf32> to vector<4x1xf32>
    %56 = vector.shape_cast %53 : vector<4x1xf32> to vector<1x4x1xf32>
    tpu.vector_store %arg4[%c0_19, %c0_20, %c0_21], %56 {strides = array<i32>} : memref<1x4x1xf32, #tpu.memory_space<vmem>>, vector<1x4x1xf32>,
    %c0_22 = arith.constant 0 : index
    %c0_23 = arith.constant 0 : index
    %c0_24 = arith.constant 0 : index
    %57 = vector.load %arg5[%c0_22, %c0_23, %c0_24] : memref<1x4x1xf32, #tpu.memory_space<vmem>>, vector<1x4x1xf32>
    %58 = vector.shape_cast %57 : vector<1x4x1xf32> to vector<4x1xf32>
    %59 = arith.mulf %20, %11 : vector<4x256xf32>
    %cst_25 = arith.constant dense<0.000000e+00> : vector<4xf32>
    %60 = vector.multi_reduction <add>, %59, %cst_25 [1] : vector<4x256xf32> to vector<4xf32>
    %61 = vector.shape_cast %60 : vector<4xf32> to vector<4x1xf32>
    %62 = arith.addf %58, %61 : vector<4x1xf32>
    %c0_26 = arith.constant 0 : index
    %c0_27 = arith.constant 0 : index
    %c0_28 = arith.constant 0 : index
    %63 = vector.load %arg5[%c0_26, %c0_27, %c0_28] : memref<1x4x1xf32, #tpu.memory_space<vmem>>, vector<1x4x1xf32>
    %64 = vector.shape_cast %63 : vector<1x4x1xf32> to vector<4x1xf32>
    %65 = vector.shape_cast %62 : vector<4x1xf32> to vector<1x4x1xf32>
    tpu.vector_store %arg5[%c0_26, %c0_27, %c0_28], %65 {strides = array<i32>} : memref<1x4x1xf32, #tpu.memory_space<vmem>>, vector<1x4x1xf32>,
    %c0_29 = arith.constant 0 : index
    %c0_30 = arith.constant 0 : index
    %c0_31 = arith.constant 0 : index
    %66 = vector.load %arg6[%c0_29, %c0_30, %c0_31] : memref<1x4x1xf32, #tpu.memory_space<vmem>>, vector<1x4x1xf32>
    %67 = vector.shape_cast %66 : vector<1x4x1xf32> to vector<4x1xf32>
    %cst_32 = arith.constant dense<0.000000e+00> : vector<4xf32>
    %68 = vector.multi_reduction <add>, %11, %cst_32 [1] : vector<4x256xf32> to vector<4xf32>
    %69 = vector.shape_cast %68 : vector<4xf32> to vector<4x1xf32>
    %70 = arith.addf %67, %69 : vector<4x1xf32>
    %c0_33 = arith.constant 0 : index
    %c0_34 = arith.constant 0 : index
    %c0_35 = arith.constant 0 : index
    %71 = vector.load %arg6[%c0_33, %c0_34, %c0_35] : memref<1x4x1xf32, #tpu.memory_space<vmem>>, vector<1x4x1xf32>
    %72 = vector.shape_cast %71 : vector<1x4x1xf32> to vector<4x1xf32>
    %73 = vector.shape_cast %70 : vector<4x1xf32> to vector<1x4x1xf32>
    tpu.vector_store %arg6[%c0_33, %c0_34, %c0_35], %73 {strides = array<i32>} : memref<1x4x1xf32, #tpu.memory_space<vmem>>, vector<1x4x1xf32>,
    %c0_36 = arith.constant 0 : index
    %c0_37 = arith.constant 0 : index
    %c0_38 = arith.constant 0 : index
    %74 = vector.load %arg7[%c0_36, %c0_37, %c0_38] : memref<1x1x1xf32, #tpu.memory_space<vmem>>, vector<1x1x1xf32>
    %75 = vector.shape_cast %74 : vector<1x1x1xf32> to vector<1x1xf32>
    %cst_39 = arith.constant dense<0.000000e+00> : vector<1xf32>
    %76 = vector.multi_reduction <add>, %26, %cst_39 [1] : vector<1x256xf32> to vector<1xf32>
    %77 = vector.shape_cast %76 : vector<1xf32> to vector<1x1xf32>
    %78 = arith.addf %75, %77 : vector<1x1xf32>
    %c0_40 = arith.constant 0 : index
    %c0_41 = arith.constant 0 : index
    %c0_42 = arith.constant 0 : index
    %79 = vector.load %arg7[%c0_40, %c0_41, %c0_42] : memref<1x1x1xf32, #tpu.memory_space<vmem>>, vector<1x1x1xf32>
    %80 = vector.shape_cast %79 : vector<1x1x1xf32> to vector<1x1xf32>
    %81 = vector.shape_cast %78 : vector<1x1xf32> to vector<1x1x1xf32>
    tpu.vector_store %arg7[%c0_40, %c0_41, %c0_42], %81 {strides = array<i32>} : memref<1x1x1xf32, #tpu.memory_space<vmem>>, vector<1x1x1xf32>,
    %c0_43 = arith.constant 0 : index
    %c0_44 = arith.constant 0 : index
    %c0_45 = arith.constant 0 : index
    %82 = vector.load %arg8[%c0_43, %c0_44, %c0_45] : memref<1x1x1xf32, #tpu.memory_space<vmem>>, vector<1x1x1xf32>
    %83 = vector.shape_cast %82 : vector<1x1x1xf32> to vector<1x1xf32>
    %cst_46 = arith.constant dense<0.000000e+00> : vector<1xf32>
    %84 = vector.multi_reduction <add>, %31, %cst_46 [1] : vector<1x256xf32> to vector<1xf32>
    %85 = vector.shape_cast %84 : vector<1xf32> to vector<1x1xf32>
    %86 = arith.addf %83, %85 : vector<1x1xf32>
    %c0_47 = arith.constant 0 : index
    %c0_48 = arith.constant 0 : index
    %c0_49 = arith.constant 0 : index
    %87 = vector.load %arg8[%c0_47, %c0_48, %c0_49] : memref<1x1x1xf32, #tpu.memory_space<vmem>>, vector<1x1x1xf32>
    %88 = vector.shape_cast %87 : vector<1x1x1xf32> to vector<1x1xf32>
    %89 = vector.shape_cast %86 : vector<1x1xf32> to vector<1x1x1xf32>
    tpu.vector_store %arg8[%c0_47, %c0_48, %c0_49], %89 {strides = array<i32>} : memref<1x1x1xf32, #tpu.memory_space<vmem>>, vector<1x1x1xf32>,
    %c0_50 = arith.constant 0 : index
    %c0_51 = arith.constant 0 : index
    %c0_52 = arith.constant 0 : index
    %90 = vector.load %arg9[%c0_50, %c0_51, %c0_52] : memref<1x1x1xf32, #tpu.memory_space<vmem>>, vector<1x1x1xf32>
    %91 = vector.shape_cast %90 : vector<1x1x1xf32> to vector<1x1xf32>
    %cst_53 = arith.constant dense<0.000000e+00> : vector<1xf32>
    %92 = vector.multi_reduction <add>, %48, %cst_53 [1] : vector<1x256xf32> to vector<1xf32>
    %93 = vector.shape_cast %92 : vector<1xf32> to vector<1x1xf32>
    %94 = arith.addf %91, %93 : vector<1x1xf32>
    %c0_54 = arith.constant 0 : index
    %c0_55 = arith.constant 0 : index
    %c0_56 = arith.constant 0 : index
    %95 = vector.load %arg9[%c0_54, %c0_55, %c0_56] : memref<1x1x1xf32, #tpu.memory_space<vmem>>, vector<1x1x1xf32>
    %96 = vector.shape_cast %95 : vector<1x1x1xf32> to vector<1x1xf32>
    %97 = vector.shape_cast %94 : vector<1x1xf32> to vector<1x1x1xf32>
    tpu.vector_store %arg9[%c0_54, %c0_55, %c0_56], %97 {strides = array<i32>} : memref<1x1x1xf32, #tpu.memory_space<vmem>>, vector<1x1x1xf32>,
    return
  }
  func.func @transform_0(%arg0: i32, %arg1: i32) -> (i32, i32, i32) {
    %c0_i32 = arith.constant 0 : i32
    %c0_i32_0 = arith.constant 0 : i32
    return %arg0, %c0_i32, %arg1 : i32, i32, i32
  }
  func.func @transform_1(%arg0: i32, %arg1: i32) -> (i32, i32, i32) {
    %c0_i32 = arith.constant 0 : i32
    %c0_i32_0 = arith.constant 0 : i32
    return %arg0, %c0_i32, %arg1 : i32, i32, i32
  }
  func.func @transform_2(%arg0: i32, %arg1: i32) -> (i32, i32, i32) {
    %c0_i32 = arith.constant 0 : i32
    %c0_i32_0 = arith.constant 0 : i32
    %c0_i32_1 = arith.constant 0 : i32
    return %arg0, %c0_i32, %c0_i32_0 : i32, i32, i32
  }
  func.func @transform_3(%arg0: i32, %arg1: i32) -> (i32, i32, i32) {
    %c0_i32 = arith.constant 0 : i32
    %c0_i32_0 = arith.constant 0 : i32
    %c0_i32_1 = arith.constant 0 : i32
    return %arg0, %c0_i32, %c0_i32_0 : i32, i32, i32
  }
  func.func @transform_4(%arg0: i32, %arg1: i32) -> (i32, i32, i32) {
    %c0_i32 = arith.constant 0 : i32
    %c0_i32_0 = arith.constant 0 : i32
    %c0_i32_1 = arith.constant 0 : i32
    return %arg0, %c0_i32, %c0_i32_0 : i32, i32, i32
  }
  func.func @transform_5(%arg0: i32, %arg1: i32) -> (i32, i32, i32) {
    %c0_i32 = arith.constant 0 : i32
    %c0_i32_0 = arith.constant 0 : i32
    %c0_i32_1 = arith.constant 0 : i32
    return %arg0, %c0_i32, %c0_i32_0 : i32, i32, i32
  }
  func.func @transform_6(%arg0: i32, %arg1: i32) -> (i32, i32, i32) {
    %c0_i32 = arith.constant 0 : i32
    %c0_i32_0 = arith.constant 0 : i32
    %c0_i32_1 = arith.constant 0 : i32
    return %arg0, %c0_i32, %c0_i32_0 : i32, i32, i32
  }
  func.func @transform_7(%arg0: i32, %arg1: i32) -> (i32, i32, i32) {
    %c0_i32 = arith.constant 0 : i32
    %c0_i32_0 = arith.constant 0 : i32
    %c0_i32_1 = arith.constant 0 : i32
    return %arg0, %c0_i32, %c0_i32_0 : i32, i32, i32
  }
}

</mosaic_0001>

<bundles_post_ra>
// kernel: tpu_custom_call.1
= control target key start
LH: loop header
LB: loop body
LE: loop exit
PB: predicated region body
PF: predicated region fallthrough
CT: control target
= control target key end

     0   :  { %13 = vsyncpa [#allocation3], 0  ;;  %s1357_s0 = inlined_call_operand.hbm [shape: f32[2,4,256], index: 0, kind: input, shape index: {}]   ;;  %s1358_s1 = inlined_call_operand.hbm [shape: s32[2,1,256], index: 1, kind: input, shape index: {}]   ;;  %s1359_s2 = inlined_call_operand.vmem [shape: f32[2,4,1], index: 2, kind: output, shape index: {0}]   ;;  %s1360_s3 = inlined_call_operand.vmem [shape: f32[2,4,1], index: 3, kind: output, shape index: {1}]   ;;  %s1361_s4 = inlined_call_operand.vmem [shape: f32[2,4,1], index: 4, kind: output, shape index: {2}]   ;;  %s1362_s5 = inlined_call_operand.vmem [shape: f32[2,1,1], index: 5, kind: output, shape index: {3}]   ;;  %s1363_s6 = inlined_call_operand.vmem [shape: f32[2,1,1], index: 6, kind: output, shape index: {4}]   ;;  %s1364_s7 = inlined_call_operand.vmem [shape: f32[2,1,1], index: 7, kind: output, shape index: {5}]  }
   0x1   :  { %15 = vsyncpa [#allocation3 + $0x1], 0 }
   0x2   :  { %16 = vsyncpa [#allocation5], 0 }
   0x3   :  { %18 = vsyncpa [#allocation5 + $0x1], 0  ;;  %s1119_s24 = smov 0   ;;  %s1121_s25 = smov 0  }
   0x4   :  { %s1123_s26 = smov 0   ;;  %s1125_s27 = smov 0  }
   0x5   :  { %s1127_s28 = smov 0   ;;  %s1129_s29 = smov 0  }
   0x6 LB: > { %s860_s30 = sadd.s32 4294967295, %s1074_s29   ;;  %s36_s8 = sadd.s32 1, %s1070_s28  ;;  %s1074_s29 = sphi %s1129_s29, %s24_s29   ;;  %s1070_s28 = sphi %s1127_s28, %s1373_s28   ;;  %s1066_s27 = sphi %s1125_s27, %s1372_s27   ;;  %s1062_s26 = sphi %s1123_s26, %s1371_s26   ;;  %s1058_s25 = sphi %s1121_s25, %s1370_s25   ;;  %s1054_s24 = sphi %s1119_s24, %s1369_s24  }
   0x7   : > { %p38_p0 = scmp.ge.s32.totalorder %s36_s8, 2  ;;  %s45_s9 = sadd.s32 1, %s1062_s26 }
   0x8   : > { %p52_p1 = scmp.ne.s32.totalorder %s1062_s26, %s1058_s25  ;;  %p53_p2 = scmp.eq.s32.totalorder %s1074_s29, 0 }
   0x9   : > { %s1375_s8 = smov (%p38_p0, %s36_s8), 0  ;;  %p58_p4 = scmp.ne.s32.totalorder %s1058_s25, %s1054_s24 }
   0xa   : > { %p1155_p3 = por %p53_p2, %p52_p1  ;;  %s40_s11 = ssub.s32 %s1070_s28, %s1375_s8 }
   0xb   : > { %p59_p5 = scmp.eq.s32.totalorder %s860_s30, 0  ;;  %p43_p6 = scmp.eq.s32.totalorder %s40_s11, 0 }
   0xc   : > { %p893_p8 = scmp.lt.s32.totalorder %s1074_s29, 2  ;;  %s1171_s14 = sand.u32 1, %s1062_s26  }
   0xd   : > { %p1162_p7 = por %p59_p5, %p58_p4  ;;  %s880_s15 = sshll.u32 %s1070_s28, 7 }
   0xe   : > { %s1168_s13 = scalar_select %p43_p6, %s1062_s26, %s45_s9  }
   0xf   : > { %s864_s16 = sshll.u32 %s1171_s14, 3  ;;  %s278_s19 = scalar_lea.hbm %s1357_s0, %s880_s15 }
  0x10   : > { %s270_s20 = scalar_lea.vmem [#allocation2], %s864_s16  ;;  %p1180_p9 = pnand %p893_p8, %p1155_p3 }
  0x11   : > { %s280_s21 = sshll.u32 %s270_s20, 4  ;;  %p870_p10 = scmp.ge.s32.totalorder %s1074_s29, 1  ;;  %s281_s21 = int_to_ptr.vmem [resolvable:$true] %s280_s21 }
  0x12   : > { %p306_p11 = scmp.lt.s32.totalorder %s1074_s29, 3  ;;  %s267_s23 = scalar_lea.sflag [#allocation3], %s1171_s14 }
  0x13   : > { %p966_p12 = pneg %p1180_p9  ;;  %s977_s24 = scalar_lea.vmem %s281_s21, 128 }
  0x14   : > { %p978_p13 = scmp.ne.s32.totalorder %s281_s21, %s977_s24  ;;  %s1076_s30 = smov [#allocation2]  }
  0x15   : > { %s982_s9 = sshll.u32 %s1076_s30, 4  ;;  %s983_s9 = int_to_ptr.vmem [resolvable:$false] %s982_s9 }
  0x16   : > { %p980_p0 = pnand %p978_p13, %p966_p12  ;;  %s984_s10 = scalar_lea.vmem %s983_s9, 256 }
  0x17   : > { %p985_p2 = scmp.lt.s32.totalorder %s281_s21, %s983_s9  ;;  %p986_p3 = scmp.lt.s32.totalorder %s984_s10, %s977_s24 }
  0x18   : > { %p981_p1 = pneg %p980_p0 }
  0x19   : > { %p987_p4 = por %p986_p3, %p985_p2 }
  0x1b   : > { %p988_p5 = pnand %p987_p4, %p981_p1 }
  0x1d   : > { %991 = shalt.err (!%p988_p5)
}
  0x1e   : > { %889 = dma.hbm_to_vmem [thread:$0]  (!%p1180_p9), %s278_s19, 128, %s281_s21, %s267_s23  }
  0x1f   : > { %p1198_p6 = pnand %p870_p10, %p306_p11  ;;  %s867_s15 = sshll.u32 %s1171_s14, 1 }
  0x20   : > { %s881_s16 = sshll.u32 %s1070_s28, 5  ;;  %s291_s24 = scalar_lea.vmem [#allocation4], %s867_s15 }
  0x21   : > { %s299_s20 = scalar_lea.hbm %s1358_s1, %s881_s16  ;;  %s301_s30 = sshll.u32 %s291_s24, 4  ;;  %s302_s30 = int_to_ptr.vmem [resolvable:$true] %s301_s30 }
  0x22   : > { %s288_s9 = scalar_lea.sflag [#allocation5], %s1171_s14  ;;  %s1005_s10 = scalar_lea.vmem %s302_s30, 32 }
  0x23   : > { %p1006_p8 = scmp.ne.s32.totalorder %s302_s30, %s1005_s10  ;;  %s1077_s19 = smov [#allocation4]  }
  0x24   : > { %s1010_s21 = sshll.u32 %s1077_s19, 4  ;;  %s1011_s21 = int_to_ptr.vmem [resolvable:$false] %s1010_s21 }
  0x25   : > { %p1008_p13 = pnand %p1006_p8, %p966_p12  ;;  %s1012_s23 = scalar_lea.vmem %s1011_s21, 64 }
  0x26   : > { %p1013_p10 = scmp.lt.s32.totalorder %s302_s30, %s1011_s21  ;;  %p1014_p11 = scmp.lt.s32.totalorder %s1012_s23, %s1005_s10 }
  0x27   : > { %p1009_p0 = pneg %p1008_p13 }
  0x28   : > { %p1015_p1 = por %p1014_p11, %p1013_p10 }
  0x2a   : > { %p1016_p2 = pnand %p1015_p1, %p1009_p0 }
  0x2c   : > { %1019 = shalt.err (!%p1016_p2)
}
  0x2d   : > { %892 = dma.hbm_to_vmem [thread:$0]  (!%p1180_p9), %s299_s20, 32, %s302_s30, %s288_s9  }
  0x2e   : > { %310 = sbr.rel (%p1198_p6) target bundleno = 292 (0x124), region = 28  ;;  %s312_s14 = sand.u32 (!%p1198_p6), 1, %s1058_s25  }
  0x2f   : > { %s871_s15 = sshll.u32 (!%p1198_p6), %s312_s14, 3  ;;  %s313_s16 = scalar_lea.sflag (!%p1198_p6), [#allocation3], %s312_s14 }
  0x30   : > { %s316_s17 = scalar_lea.vmem (!%p1198_p6), [#allocation2], %s871_s15 }
  0x33   : > { %1045 = dma.done.wait (%p1162_p7), %s313_s16, 128  }
  0x34   : > { %1047 = vsyncadd (%p1162_p7), %s313_s16, 4294967168  ;;  %s872_s18 = sshll.u32 %s312_s14, 1  ;;  %s322_s24 = scalar_lea.sflag [#allocation5], %s312_s14 }
  0x35   : > { %s325_s10 = scalar_lea.vmem [#allocation4], %s872_s18 }
  0x36   : > { %1049 = dma.done.wait (%p1162_p7), %s322_s24, 32  }
  0x37   : > { %1051 = vsyncadd (%p1162_p7), %s322_s24, 4294967264  ;;  %v414_v0 = vlaneseq  ;;  %p379_p9 = scmp.lt.s32.totalorder %s1066_s27, 1  ;;  %vm404_vm0 = vcmask 3072   ;;  %vm433_vm1 = vcmask 1043456   ;;  %v1078_v4 = vmov 0.0   ;;  %v1240_v6 = vld [vmem:[%s316_s17] sm:$0xff] }
  0x38   : > { %v413_v5 = vld [vmem:[%s325_s10] sm:$0x3]  ;;  %v1244_v9 = vcombine.high %v1240_v6, %v1240_v6  ;;  %v434_v10 = vsel %vm433_vm1, %v1240_v6, -inf  ;;  %vm408_vm6 = vcmask 0  }
  0x39   : > { %v415_v1 = vshrl.u32 %v414_v0, 7  ;;  %s1377_s27 = smov (!%p379_p9, %s1066_s27), 1  ;;  %v435_v11 = vrot.slane %v434_v10, 4 }
  0x3a   : > { %s1229_s22 = sshll.u32 %s1377_s27, 2  ;;  %v441_v12 = vsel %vm433_vm1, %v1244_v9, -inf  ;;  %s393_s14 = scalar_lea.vmem %s1362_s5, %s1377_s27 }
  0x3b   : > { %v418_v2 = vsub.s32 0, %v415_v1  ;;  %v422_v3 = vsub.s32 1, %v415_v1  ;;  %s1235_s12 = scalar_lea.vmem %s1361_s4, %s1229_s22  ;;  %v436_v15 = vmax.f32 %v434_v10, %v435_v11  ;;  %v442_v16 = vrot.slane %v441_v12, 4  ;;  %s1273_s19 = scalar_lea.vmem %s1359_s2, %s1229_s22  ;;  %409 = vst.msk [vmem:[%s393_s14] sm:$0x1] %vm408_vm6, %v1078_v4 }
  0x3c   : > { %407 = vst.msk [vmem:[%s1235_s12] sm:$0xf] %vm404_vm0, %v1078_v4  ;;  %405 = vst.msk [vmem:[%s1273_s19] sm:$0xf] %vm404_vm0, %v1078_v4  ;;  %v510_v11 = vsel %vm433_vm1, %v1240_v6, 0.0  ;;  %s386_s17 = scalar_lea.vmem %s1360_s3, %s1229_s22  ;;  %s399_s10 = scalar_lea.vmem %s1364_s7, %s1377_s27 }
  0x3d   : > { %v419_v7 = vrot.slane %v413_v5, %v418_v2  ;;  %v423_v8 = vrot.slane %v413_v5, %v422_v3  ;;  %v437_v21 = vrot.slane %v436_v15, 2  ;;  %v443_v22 = vmax.f32 %v441_v12, %v442_v16  ;;  %406 = vst.msk [vmem:[%s386_s17] sm:$0xf] %vm404_vm0, %v1078_v4  ;;  %s396_s22 = scalar_lea.vmem %s1363_s6, %s1377_s27 }
  0x3e   : > { %v511_v16 = vrot.slane %v510_v11, 4  ;;  %411 = vst.msk [vmem:[%s399_s10] sm:$0x1] %vm408_vm6, %v1078_v4  ;;  %410 = vst.msk [vmem:[%s396_s22] sm:$0x1] %vm408_vm6, %v1078_v4 }
  0x3f   : > { %vm424_vm2 = vcmp.eq.s32.totalorder %v415_v1, %v419_v7  ;;  %vm425_vm3 = vcmp.eq.s32.totalorder %v415_v1, %v423_v8  ;;  %v438_v24 = vmax.f32 %v436_v15, %v437_v21  ;;  %v444_v25 = vrot.slane %v443_v22, 2 }
  0x40   : > { %v876_v13 = vsel %vm424_vm2, 1.0, %v1078_v4  ;;  %v877_v14 = vsel %vm425_vm3, 1.0, %v1078_v4 }
  0x41   : > { %v595_v17 = vsel %vm433_vm1, %v876_v13, 0.0  ;;  %v596_v18 = vsel %vm433_vm1, %v877_v14, 0.0  ;;  %v1254_v19 = vcombine.low %v876_v13, %v877_v14  ;;  %v439_v28 = vrot.slane %v438_v24, 1 }
  0x42   : > { %v597_v20 = vadd.f32 %v596_v18, %v595_v17  ;;  %v445_v29 = vmax.f32 %v443_v22, %v444_v25  ;;  %v517_v14 = vsel %vm433_vm1, %v1244_v9, 0.0 }
  0x43   : > { %v488_v23 = vmul.f32 %v1254_v19, %v1240_v6  ;;  %v1260_v32 = vmax.f32 %v438_v24, %v439_v28 }
  0x44   : > { %598 = vadd.xlane.f32.xlu1 %v597_v20  ;;  %v446_v33 = vrot.slane %v445_v29, 1  ;;  %v518_v20 = vrot.slane %v517_v14, 4 }
  0x45   : > { %v490_v26 = vcombine.high %v488_v23, %v488_v23  ;;  %v492_v27 = vsel %vm433_vm1, %v488_v23, 0.0  ;;  %v512_v23 = vadd.f32 %v511_v16, %v510_v11 }
  0x46   : > { %v493_v30 = vrot.slane %v492_v27, 4  ;;  %v1262_v36 = vmax.f32 %v445_v29, %v446_v33 }
  0x47   : > { %v499_v31 = vsel %vm433_vm1, %v490_v26, 0.0  ;;  %v519_v26 = vadd.f32 %v518_v20, %v517_v14  ;;  %v513_v29 = vrot.slane %v512_v23, 2 }
  0x48   : > { %v494_v34 = vadd.f32 %v493_v30, %v492_v27  ;;  %v500_v35 = vrot.slane %v499_v31, 4  ;;  %v450_v39 = vcombine.low %v1260_v32, %v1262_v36 }
  0x4a   : > { %v495_v37 = vrot.slane %v494_v34, 2  ;;  %v501_v38 = vadd.f32 %v500_v35, %v499_v31  ;;  %v452_v42 = vsub.f32 %v1240_v6, %v450_v39  ;;  %v520_v35 = vrot.slane %v519_v26, 2 }
  0x4c   : > { %v496_v40 = vadd.f32 %v495_v37, %v494_v34  ;;  %v502_v41 = vrot.slane %v501_v38, 2  ;;  %v453_v45 = vmul.f32 1.442695, %v452_v42 }
  0x4e   : > { %v497_v43 = vrot.slane %v496_v40, 1  ;;  %v503_v44 = vadd.f32 %v502_v41, %v501_v38  ;;  %944 = vpow2.f32 %v453_v45  ;;  %v514_v41 = vadd.f32 %v513_v29, %v512_v23 }
  0x4f   : > { %v521_v45 = vadd.f32 %v520_v35, %v519_v26 }
  0x50   : > { %v1267_v46 = vadd.f32 %v497_v43, %v496_v40  ;;  %v504_v47 = vrot.slane %v503_v44, 1 }
  0x52   : > { %v1278_v48 = vadd.f32 %v504_v47, %v503_v44  ;;  %v530_v49 = vand.u32 2147483647, %v1267_v46  ;;  %v526_v24 = vsub.f32 0.0, %v1267_v46 }
  0x54   : > { %v531_v50 = vand.u32 2147483647, %v1278_v48  ;;  %v532_v51 = vsub.f32 0.0, %v530_v49  ;;  %v527_v27 = vsub.f32 0.0, %v1278_v48  ;;  %v528_v31 = vmax.f32 %v526_v24, 0.0 }
  0x56   : > { %v533_v52 = vsub.f32 0.0, %v531_v50  ;;  %v534_v53 = vmul.f32 1.442695, %v532_v51  ;;  %v529_v38 = vmax.f32 %v527_v27, 0.0  ;;  %v602_v27 = vld [vmem:[%s393_s14] sm:$0x1] }
  0x58   : > { %946 = vpow2.f32 %v534_v53  ;;  %v536_v54 = vmul.f32 1.442695, %v533_v52  ;;  %v515_v52 = vrot.slane %v514_v41, 1 }
  0x5a   : > { %948 = vpow2.f32 %v536_v54 }
  0x5b   : > { %v1282_v55 = vpop.eup %944 }
  0x5c   : > { %v456_v56 = vcombine.high %v1282_v55, %v1282_v55  ;;  %v458_v57 = vsel %vm433_vm1, %v1282_v55, 0.0 }
  0x5d   : > { %v459_v58 = vrot.slane %v458_v57, 4 }
  0x5e   : > { %v465_v59 = vsel %vm433_vm1, %v456_v56, 0.0 }
  0x5f   : > { %v460_v60 = vadd.f32 %v459_v58, %v458_v57  ;;  %v466_v61 = vrot.slane %v465_v59, 4 }
  0x61   : > { %v461_v63 = vrot.slane %v460_v60, 2  ;;  %v467_v0 = vadd.f32 %v466_v61, %v465_v59  ;;  %v522_v59 = vrot.slane %v521_v45, 1 }
  0x63   : > { %v462_v3 = vadd.f32 %v461_v63, %v460_v60  ;;  %v468_v5 = vrot.slane %v467_v0, 2 }
  0x65   : > { %v947_v62 = vpop.eup %946  ;;  %v463_v8 = vrot.slane %v462_v3, 1  ;;  %v469_v10 = vadd.f32 %v468_v5, %v467_v0  ;;  %v516_v0 = vadd.f32 %v515_v52, %v514_v41 }
  0x66   : > { %v538_v1 = vadd.f32 1.0, %v947_v62  ;;  %v541_v15 = vmul.f32 -0.5, %v947_v62  ;;  %v544_v6 = vand.u32 2147483647, %v947_v62 }
  0x67   : > { %v949_v2 = vpop.eup %948  ;;  %v464_v12 = vadd.f32 %v463_v8, %v462_v3  ;;  %v470_v13 = vrot.slane %v469_v10, 1  ;;  %v523_v8 = vadd.f32 %v522_v59, %v521_v45 }
  0x68   : > { %950 = vlog2.f32 %v538_v1  ;;  %v547_v7 = vadd.f32 1.0, %v949_v2  ;;  %v550_v18 = vmul.f32 -0.5, %v949_v2  ;;  %v542_v22 = vadd.f32 1.0, %v541_v15 }
  0x69   : > { %v471_v17 = vadd.f32 %v470_v13, %v469_v10  ;;  %v553_v28 = vand.u32 2147483647, %v949_v2  ;;  %vm545_vm4 = vcmp.lt.f32.partialorder %v544_v6, 0.0004427343  ;;  %v594_v6 = vld [vmem:[%s1235_s12] sm:$0xf] }
  0x6a   : > { %952 = vlog2.f32 %v547_v7  ;;  %v551_v25 = vadd.f32 1.0, %v550_v18  ;;  %v543_v9 = vmul.f32 %v947_v62, %v542_v22 }
  0x6b   : > { %954 = vlog2.f32 %v464_v12  ;;  %v474_v21 = vcombine.low %v464_v12, %v471_v17  ;;  %vm554_vm5 = vcmp.lt.f32.partialorder %v553_v28, 0.0004427343  ;;  %v570_v28 = vld [vmem:[%s1273_s19] sm:$0xf] }
  0x6c   : > { %956 = vlog2.f32 %v471_v17  ;;  %v552_v34 = vmul.f32 %v949_v2, %v551_v25 }
  0x6d   : > { %958 = vrcp.f32 %v474_v21 }
  0x75   : > { %v951_v30 = vpop.eup %950 }
  0x76   : > { %v540_v33 = vmul.f32 0.6931472, %v951_v30 }
  0x77   : > { %v953_v37 = vpop.eup %952 }
  0x78   : > { %v546_v39 = vsel %vm545_vm4, %v543_v9, %v540_v33  ;;  %v549_v40 = vmul.f32 0.6931472, %v953_v37  ;;  %v955_v43 = vpop.eup %954  ;;  %v582_v33 = vld [vmem:[%s386_s17] sm:$0xf] }
  0x79   : > { %v556_v42 = vadd.f32 %v546_v39, %v528_v31  ;;  %v479_v47 = vmul.f32 0.6931472, %v955_v43  ;;  %v957_v51 = vpop.eup %956  ;;  %v609_v37 = vld [vmem:[%s396_s22] sm:$0x1] }
  0x7a   : > { %v555_v44 = vsel %vm554_vm5, %v552_v34, %v549_v40  ;;  %v481_v53 = vmul.f32 0.6931472, %v957_v51  ;;  %v959_v58 = vpop.eup %958  ;;  %v615_v39 = vld [vmem:[%s399_s10] sm:$0x1] }
  0x7b   : > { %v557_v49 = vadd.f32 %v555_v44, %v529_v38  ;;  %v558_v50 = vsub.f32 0.0, %v556_v42  ;;  %v482_v54 = vadd.f32 %v479_v47, %v1260_v32  ;;  %v477_v60 = vmul.f32 %v959_v58, %v1282_v55 }
  0x7c   : > { %v483_v61 = vadd.f32 %v481_v53, %v1262_v36 }
  0x7d   : > { %v559_v56 = vsub.f32 0.0, %v557_v49  ;;  %v560_v57 = vmul.f32 1.442695, %v558_v50  ;;  %v506_v62 = vsub.f32 %v482_v54, %v1267_v46  ;;  %v572_v1 = vcombine.high %v477_v60, %v477_v60 }
  0x7e   : > { %v574_v2 = vsel %vm433_vm1, %v477_v60, 0.0  ;;  %v507_v3 = vsub.f32 %v483_v61, %v1278_v48  ;;  %v583_v32 = vmul.f32 %v1254_v19, %v477_v60  ;;  %v508_v5 = vmul.f32 4.0, %v482_v54 }
  0x7f   : > { %960 = vpow2.f32 %v560_v57  ;;  %v562_v63 = vmul.f32 1.442695, %v559_v56  ;;  %v509_v7 = vmul.f32 4.0, %v483_v61  ;;  %v575_v55 = vsel %vm433_vm1, %v572_v1, 0.0 }
  0x80   : > { %v603_v10 = vadd.f32 %v507_v3, %v506_v62  ;;  %v585_v36 = vcombine.high %v583_v32, %v583_v32  ;;  %v587_v46 = vsel %vm433_vm1, %v583_v32, 0.0  ;;  %v576_v11 = vadd.f32 %v575_v55, %v574_v2 }
  0x81   : > { %962 = vpow2.f32 %v562_v63  ;;  %v524_v13 = vsub.f32 %v508_v5, %v516_v0  ;;  %v525_v19 = vsub.f32 %v509_v7, %v523_v8 }
  0x82   : > { %604 = vadd.xlane.f32.xlu1 %v603_v10  ;;  %v588_v12 = vsel %vm433_vm1, %v585_v36, 0.0  ;;  %577 = vadd.xlane.f32.xlu0 %v576_v11 }
  0x83   : > { %v589_v48 = vadd.f32 %v588_v12, %v587_v46  ;;  %v610_v14 = vadd.f32 %v525_v19, %v524_v13 }
  0x86   : > { %590 = vadd.xlane.f32.xlu0 %v589_v48 }
  0x8a   : > { %611 = vadd.xlane.f32.xlu0 %v610_v14 }
  0x8c   : > { %v961_v15 = vpop.eup %960 }
  0x8d   : > { %v564_v16 = vsub.f32 1.0, %v961_v15 }
  0x8e   : > { %v963_v17 = vpop.eup %962 }
  0x8f   : > { %v566_v18 = vmul.f32 %v564_v16, %v564_v16  ;;  %v565_v20 = vsub.f32 1.0, %v963_v17 }
  0x91   : > { %v567_v21 = vmul.f32 %v565_v20, %v565_v20  ;;  %v568_v22 = vmul.f32 %v566_v18, %v556_v42 }
  0x93   : > { %v569_v23 = vmul.f32 %v567_v21, %v557_v49 }
  0x95   : > { %v616_v24 = vadd.f32 %v569_v23, %v568_v22 }
  0x97   : > { %617 = vadd.xlane.f32.xlu1 %v616_v24 }
  0xcd   : > { %v599_v25 = vpop.xlane.xlu1 %598 }
  0xce   : > { %v600_v26 = vadd.f32 %v599_v25, %v594_v6 }
  0xd0   : > { %601 = vst.msk [vmem:[%s1235_s12] sm:$0xf] %vm404_vm0, %v600_v26 }
 0x10b   : > { %v605_v9 = vpop.xlane.xlu1 %604  ;;  %v578_v29 = vpop.xlane.xlu0 %577 }
 0x10c   : > { %v606_v30 = vadd.f32 %v605_v9, %v602_v27  ;;  %v579_v31 = vadd.f32 %v578_v29, %v570_v28 }
 0x10e   : > { %608 = vst.msk [vmem:[%s393_s14] sm:$0x1] %vm408_vm6, %v606_v30 }
 0x10f   : > { %581 = vst.msk [vmem:[%s1273_s19] sm:$0xf] %vm404_vm0, %v579_v31  ;;  %v591_v34 = vpop.xlane.xlu0 %590 }
 0x110   : > { %v592_v35 = vadd.f32 %v591_v34, %v582_v33 }
 0x112   : > { %593 = vst.msk [vmem:[%s386_s17] sm:$0xf] %vm404_vm0, %v592_v35 }
 0x113   : > { %v612_v4 = vpop.xlane.xlu0 %611 }
 0x114   : > { %v613_v38 = vadd.f32 %v612_v4, %v609_v37 }
 0x116   : > { %614 = vst.msk [vmem:[%s396_s22] sm:$0x1] %vm408_vm6, %v613_v38 }
 0x120   : > { %v618_v40 = vpop.xlane.xlu1 %617 }
 0x121   : > { %v619_v41 = vadd.f32 %v618_v40, %v615_v39 }
 0x123   : > { %620 = vst.msk [vmem:[%s399_s10] sm:$0x1] %vm408_vm6, %v619_v41 }
 0x124 PF: > { %s24_s29 = sadd.s32 1, %s1074_s29   ;;  %s1369_s24 = smov %s1058_s25 }
 0x125   : > { %p21_p7 = scmp.ge.s32.totalorder %s24_s29, 4   ;;  %s1370_s25 = smov %s1062_s26 }
 0x126   : > { %s1371_s26 = smov %s1168_s13  ;;  %s1372_s27 = smov %s1070_s28 }
 0x127   : > { %s1373_s28 = smov %s1375_s8  ;;  %23 = sbr.rel (!%p21_p7) target bundleno = 6 (0x6), region = 145 }
 0x12c   :  { %704 = vsyncpa [#allocation3], 1 }
 0x12d   :  { %706 = vsyncpa [#allocation3 + $0x1], 1 }
 0x12e   :  { %707 = vsyncpa [#allocation5], 1 }
 0x12f   :  { %709 = vsyncpa [#allocation5 + $0x1], 1 }

</bundles_post_ra>
